<compile_context>
chip_gen: v6e
topology: v6e:2x2x1
jax: 0.10.0
libtpu: 0.0.40
codegen_flags: <defaults>
</compile_context>

<pallas_src>
import functools
import math

import jax
import jax.numpy as jnp
from jax.experimental import pallas as pl
from jax.experimental.pallas import tpu as pltpu


def _round_up(x, m):
    return ((x + m - 1) // m) * m


def _cdiv(a, b):
    return (a + b - 1) // b


def _combined_loss_kernel(p_ref, t_ref, o_ref, *, d, valid_extent, gamma, beta,
                          eps):
    """One grid step: lane-dense block -> (1, 1, 128) partial [reg, focal, fbeta]."""
    p = p_ref[...].astype(jnp.float32)
    t = t_ref[...].astype(jnp.float32)

    if p.ndim == 3:
        # Packed view (B, rows, W) with W = k*D (multiple of 128): channel id
        # is a fixed lane pattern, validity is a packed-row mask (ragged tail).
        _, tile_rows, w = p.shape
        chan = jax.lax.broadcasted_iota(jnp.int32, (1, 1, w), 2) % d
        row = (pl.program_id(0) * tile_rows
               + jax.lax.broadcasted_iota(jnp.int32, (1, tile_rows, 1), 1))
        valid = row < valid_extent                       # (1, rows, 1)
    else:
        # Flat fallback view (B, N*D): channel id / validity come from the
        # global flat offset (ragged tail along the lane axis).
        _, tile_l = p.shape
        pos = (pl.program_id(0) * tile_l
               + jax.lax.broadcasted_iota(jnp.int32, (1, tile_l), 1))
        chan = pos % d
        valid = pos < valid_extent                       # (1, lanes)

    m_reg = jnp.logical_and(valid, chan < 4)             # regression lanes
    m_cls = jnp.logical_and(valid, chan >= 4)            # class lanes
    # jnp.where (selection, not mask-multiply) so garbage in out-of-bounds
    # block regions (possibly NaN/Inf) can never poison the sums.

    # --- RegressionLoss: SmoothL1 (beta=1) on pred/128 - target/128 ----------
    diff = (p - t) * (1.0 / 128.0)
    adiff = jnp.abs(diff)
    sl1 = jnp.where(adiff < 1.0, 0.5 * diff * diff, adiff - 0.5)
    reg_sum = jnp.sum(jnp.where(m_reg, sl1, 0.0))

    # --- FocalLoss: BCE-with-logits, (1 - p_t)^gamma weight, * 0.5 -----------
    x = jnp.clip(p, -20.0, 20.0)
    tc = jnp.clip(t, 0.0, 1.0)
    ce = jnp.maximum(x, 0.0) - x * tc + jnp.log(1.0 + jnp.exp(-jnp.abs(x)))
    p_t = jnp.exp(-ce)
    one_m_pt = 1.0 - p_t
    if gamma == 2.0:                      # default path: avoid a pow lowering
        focal_w = one_m_pt * one_m_pt
    else:
        focal_w = one_m_pt ** gamma
    focal_sum = jnp.sum(jnp.where(m_cls, 0.5 * focal_w * ce, 0.0))

    # --- SoftFBetaLoss: per-(anchor, class) tp/fp/fn over the batch axis -----
    xc = jnp.clip(p, -10.0, 10.0)
    pc = 1.0 / (1.0 + jnp.exp(-xc))                      # sigmoid
    tp = jnp.sum(pc * t, axis=0, keepdims=True)
    fp = jnp.sum(pc * (1.0 - t), axis=0, keepdims=True)
    fn = jnp.sum((1.0 - pc) * t, axis=0, keepdims=True)
    precision = tp / (tp + fp + eps)
    recall = tp / (tp + fn + eps)
    b2 = beta * beta
    fbeta = (1.0 + b2) * precision * recall / (b2 * precision + recall + eps)
    fbeta_sum = jnp.sum(jnp.where(m_cls, fbeta, 0.0))

    # Lane-dense per-tile partial record: [reg, focal, fbeta, 0, ...].
    lane = jax.lax.broadcasted_iota(jnp.int32, (1, 1, 128), 2)
    o_ref[...] = (reg_sum * (lane == 0).astype(jnp.float32)
                  + focal_sum * (lane == 1).astype(jnp.float32)
                  + fbeta_sum * (lane == 2).astype(jnp.float32))


def combined_loss(predictions, targets, *, gamma=2.0, beta=4.0, eps=1e-6,
                  lambda_focal=0.5, lambda_fbeta=0.5, lambda_reg=0.5,
                  alpha=None, max_block_elems=None):
    """Pallas equivalent of CombinedLoss.forward for (B, N, 4 + C) inputs."""
    # TODO(synk): per-class `alpha` weighting (CombinedLoss(alpha=...)) is not
    # implemented; only the default alpha=None path is supported.
    if alpha is not None:
        raise NotImplementedError("alpha weighting not supported")
    assert predictions.shape == targets.shape and predictions.ndim == 3
    B, N, D = predictions.shape
    assert D > 4, "expected 4 regression channels + at least 1 class channel"
    C = D - 4
    itemsize = predictions.dtype.itemsize

    # ---- per-generation VMEM budgeting --------------------------------------
    # v7x has 64 MiB physical VMEM, v5e/v6e have 128 MiB.
    try:
        vmem_cap = int(pltpu.get_tpu_info().vmem_capacity_bytes)
    except Exception:
        vmem_cap = 64 * 1024 * 1024                      # conservative (v7x)
    vmem_limit = max(min((vmem_cap * 3) // 4, 100 * 1024 * 1024),
                     32 * 1024 * 1024)
    # Per block element: 2 inputs x 2 pipeline buffers (input dtype) plus ~8
    # live block-sized f32 temporaries created inside the kernel.
    per_elem_bytes = 2 * 2 * itemsize + 8 * 4
    if max_block_elems is None:
        max_block_elems = (vmem_limit - (2 << 20)) // per_elem_bytes
        max_block_elems = min(max_block_elems, 512 * 1024)
    max_block_elems = max(int(max_block_elems), 1024)

    kern = functools.partial(_combined_loss_kernel, d=D, gamma=gamma,
                             beta=float(beta), eps=float(eps))

    # ---- lane-dense view: FREE reshape, never jnp.pad -----------------------
    k = 128 // math.gcd(D, 128)          # smallest k with (k * D) % 128 == 0
    if N % k == 0:
        # (B, N, D) -> (B, R, W): W = k*D lanes fully dense, anchors packed
        # along the sublane axis.
        R, W = N // k, k * D
        p_v = predictions.reshape(B, R, W)
        t_v = targets.reshape(B, R, W)
        if R <= 8:
            tile = R                                     # single exact block
        else:
            max_rows = max(8, (max_block_elems // (B * W)) // 8 * 8)
            tile = min(max_rows, _round_up(_cdiv(R, 2), 8))   # >= 2 tiles
        num_tiles = _cdiv(R, tile)
        block = (B, tile, W)
        index_map = lambda i: (0, i, 0)
        valid_extent = R
    else:
        # Fallback: flat (B, N*D) view -- still lane-dense; ragged tail masked.
        L = N * D
        p_v = predictions.reshape(B, L)
        t_v = targets.reshape(B, L)
        unit = (128 * D) // math.gcd(D, 128)             # lcm(128, D)
        if L <= unit:
            tile = L                                     # single exact block
        else:
            max_lanes = max(unit, (max_block_elems // B) // unit * unit)
            tile = min(max_lanes, _round_up(_cdiv(L, 2), unit))
        num_tiles = _cdiv(L, tile)
        block = (B, tile)
        index_map = lambda i: (0, i)
        valid_extent = L

    kern = functools.partial(kern, valid_extent=valid_extent)

    cost = pl.CostEstimate(
        flops=int(40 * B * N * D),
        transcendentals=int(5 * B * N * D),
        bytes_accessed=int(2 * B * N * D * itemsize + num_tiles * 128 * 4))

    partials = pl.pallas_call(
        kern,
        out_shape=jax.ShapeDtypeStruct((num_tiles, 1, 128), jnp.float32),
        grid=(num_tiles,),
        in_specs=[pl.BlockSpec(block, index_map),
                  pl.BlockSpec(block, index_map)],
        out_specs=pl.BlockSpec((1, 1, 128), lambda i: (i, 0, 0)),
        compiler_params=pltpu.CompilerParams(
            dimension_semantics=("parallel",),
            vmem_limit_bytes=int(vmem_limit)),
        cost_estimate=cost,
    )(p_v, t_v)

    sums = jnp.sum(partials[:, 0, :3], axis=0)           # (3,) f32
    reg_loss = sums[0] / (B * N * 4)
    focal_loss = sums[1] / (B * N * C)
    fbeta_loss = 1.0 - sums[2] / (N * C)
    # TODO(synk): the PyTorch module prints a diagnostic on NaN/Inf and its
    # RegressionLoss mutates the caller's tensors in place via `/= 128`; those
    # side effects are omitted (the returned loss value is identical).
    return (lambda_focal * focal_loss + lambda_fbeta * fbeta_loss
            + lambda_reg * reg_loss)


def _reference_combined_loss(predictions, targets, *, gamma=2.0, beta=4.0,
                             eps=1e-6, lambda_focal=0.5, lambda_fbeta=0.5,
                             lambda_reg=0.5):
    """Pure-JAX mirror of the PyTorch CombinedLoss semantics."""
    p = predictions.astype(jnp.float32)
    t = targets.astype(jnp.float32)
    # FocalLoss
    x = jnp.clip(p[..., 4:], -20.0, 20.0)
    tc = jnp.clip(t[..., 4:], 0.0, 1.0)
    ce = jnp.maximum(x, 0.0) - x * tc + jnp.log(1.0 + jnp.exp(-jnp.abs(x)))
    p_t = jnp.exp(-ce)
    focal = (0.5 * ((1.0 - p_t) ** gamma) * ce).mean(axis=1).mean()
    # SoftFBetaLoss
    pc = 1.0 / (1.0 + jnp.exp(-jnp.clip(p[..., 4:], -10.0, 10.0)))
    tcr = t[..., 4:]
    tp = jnp.sum(pc * tcr, axis=0)
    fp = jnp.sum(pc * (1.0 - tcr), axis=0)
    fn = jnp.sum((1.0 - pc) * tcr, axis=0)
    precision = tp / (tp + fp + eps)
    recall = tp / (tp + fn + eps)
    fbeta = ((1.0 + beta ** 2) * precision * recall
             / (beta ** 2 * precision + recall + eps))
    fbeta_loss = 1.0 - fbeta.mean()
    # RegressionLoss
    d = p[..., :4] / 128.0 - t[..., :4] / 128.0
    ad = jnp.abs(d)
    reg = jnp.where(ad < 1.0, 0.5 * d * d, ad - 0.5).mean()
    return lambda_focal * focal + lambda_fbeta * fbeta_loss + lambda_reg * reg


if __name__ == "__main__":
    def make_inputs(key, b, n, c, dtype=jnp.float32):
        k1, k2, k3, k4 = jax.random.split(key, 4)
        preds = jnp.concatenate(
            [jax.random.normal(k1, (b, n, 4), dtype=jnp.float32) * 64.0,
             jax.random.normal(k2, (b, n, c), dtype=jnp.float32) * 15.0],
            axis=-1)
        tgts = jnp.concatenate(
            [jax.random.normal(k3, (b, n, 4), dtype=jnp.float32) * 64.0,
             (jax.random.uniform(k4, (b, n, c)) < 0.3).astype(jnp.float32)],
            axis=-1)
        return preds.astype(dtype), tgts.astype(dtype)

    cases = [
        (2, 256, 3, jnp.float32),    # packed (B, R, 896) path, single exact block
        (2, 2560, 3, jnp.float32),   # packed path, 2 parallel tiles + ragged rows
        (2, 20, 3, jnp.float32),     # flat fallback, single exact block
        (2, 300, 3, jnp.float32),    # flat fallback, 2 tiles + ragged lane tail
        (2, 2560, 3, jnp.bfloat16),  # bf16 inputs (upcast in-register)
    ]
    keys = jax.random.split(jax.random.PRNGKey(0), len(cases))
    for (b, n, c, dt), key in zip(cases, keys):
        preds, tgts = make_inputs(key, b, n, c, dt)
        out = jax.block_until_ready(combined_loss(preds, tgts))
        ref = _reference_combined_loss(preds, tgts)
        assert jnp.allclose(out, ref, rtol=1e-4, atol=1e-5), \
            (b, n, c, dt, out, ref)

    print("KERNEL_OK")
</pallas_src>

<mosaic_0001>
module attributes {stable_mosaic.version = 11 : i64} {
  func.func @_combined_loss_kernel(%arg0: i32, %arg1: memref<2x2x896xf32, #tpu.memory_space<vmem>>, %arg2: memref<2x2x896xf32, #tpu.memory_space<vmem>>, %arg3: memref<1x1x128xf32, #tpu.memory_space<vmem>>) attributes {dimension_semantics = [#tpu.dimension_semantics<parallel>], iteration_bounds = array<i64: 1>, scalar_prefetch = 0 : i64, scratch_operands = 0 : i64, tpu.core_type = #tpu.core_type<tc>, window_params = [{transform_indices = @transform_0, window_bounds = array<i64: 2, 2, 896>}, {transform_indices = @transform_1, window_bounds = array<i64: 2, 2, 896>}, {transform_indices = @transform_2, window_bounds = array<i64: 1, 1, 128>}]} {
    %c0 = arith.constant 0 : index
    %c0_0 = arith.constant 0 : index
    %c0_1 = arith.constant 0 : index
    %0 = vector.load %arg1[%c0, %c0_0, %c0_1] : memref<2x2x896xf32, #tpu.memory_space<vmem>>, vector<2x2x896xf32>
    %c0_2 = arith.constant 0 : index
    %c0_3 = arith.constant 0 : index
    %c0_4 = arith.constant 0 : index
    %1 = vector.load %arg2[%c0_2, %c0_3, %c0_4] : memref<2x2x896xf32, #tpu.memory_space<vmem>>, vector<2x2x896xf32>
    %2 = tpu.iota {dimensions = array<i32: 2>} : vector<1x1x896xi32>
    %c7_i32 = arith.constant 7 : i32
    %c0_i32 = arith.constant 0 : i32
    %3 = arith.cmpi eq, %c7_i32, %c0_i32 : i32
    %c1_i32 = arith.constant 1 : i32
    %4 = arith.select %3, %c1_i32, %c7_i32 : i32
    %5 = vector.broadcast %4 : i32 to vector<1x1x896xi32>
    %6 = arith.remsi %2, %5 : vector<1x1x896xi32>
    %c0_i32_5 = arith.constant 0 : i32
    %7 = vector.broadcast %c0_i32_5 : i32 to vector<1x1x896xi32>
    %8 = arith.cmpi ne, %6, %7 : vector<1x1x896xi32>
    %c0_i32_6 = arith.constant 0 : i32
    %9 = vector.broadcast %c0_i32_6 : i32 to vector<1x1x896xi32>
    %10 = arith.cmpi slt, %6, %9 : vector<1x1x896xi32>
    %c0_i32_7 = arith.constant 0 : i32
    %11 = arith.cmpi slt, %4, %c0_i32_7 : i32
    %12 = vector.broadcast %11 : i1 to vector<1x1x896xi1>
    %13 = vector.broadcast %12 : vector<1x1x896xi1> to vector<1x1x896xi1>
    %14 = arith.xori %10, %13 : vector<1x1x896xi1>
    %15 = arith.andi %14, %8 : vector<1x1x896xi1>
    %16 = vector.broadcast %4 : i32 to vector<1x1x896xi32>
    %17 = arith.addi %6, %16 : vector<1x1x896xi32>
    %18 = arith.select %15, %17, %6 : vector<1x1x896xi1>, vector<1x1x896xi32>
    %c2_i32 = arith.constant 2 : i32
    %19 = arith.muli %arg0, %c2_i32 : i32
    %20 = tpu.iota {dimensions = array<i32: 1>} : vector<1x2x1xi32>
    %21 = vector.broadcast %19 : i32 to vector<1x2x1xi32>
    %22 = arith.addi %21, %20 : vector<1x2x1xi32>
    %c2_i32_8 = arith.constant 2 : i32
    %23 = vector.broadcast %c2_i32_8 : i32 to vector<1x2x1xi32>
    %24 = arith.cmpi slt, %22, %23 : vector<1x2x1xi32>
    %c4_i32 = arith.constant 4 : i32
    %25 = vector.broadcast %c4_i32 : i32 to vector<1x1x896xi32>
    %26 = arith.cmpi slt, %18, %25 : vector<1x1x896xi32>
    %27 = vector.broadcast %24 : vector<1x2x1xi1> to vector<1x2x896xi1>
    %28 = vector.broadcast %26 : vector<1x1x896xi1> to vector<1x2x896xi1>
    %29 = arith.andi %27, %28 : vector<1x2x896xi1>
    %c4_i32_9 = arith.constant 4 : i32
    %30 = vector.broadcast %c4_i32_9 : i32 to vector<1x1x896xi32>
    %31 = arith.cmpi sge, %18, %30 : vector<1x1x896xi32>
    %32 = vector.broadcast %24 : vector<1x2x1xi1> to vector<1x2x896xi1>
    %33 = vector.broadcast %31 : vector<1x1x896xi1> to vector<1x2x896xi1>
    %34 = arith.andi %32, %33 : vector<1x2x896xi1>
    %35 = arith.subf %0, %1 : vector<2x2x896xf32>
    %cst = arith.constant 7.812500e-03 : f32
    %36 = vector.broadcast %cst : f32 to vector<2x2x896xf32>
    %37 = arith.mulf %35, %36 : vector<2x2x896xf32>
    %38 = math.absf %37 : vector<2x2x896xf32>
    %cst_10 = arith.constant 1.000000e+00 : f32
    %39 = vector.broadcast %cst_10 : f32 to vector<2x2x896xf32>
    %40 = arith.cmpf olt, %38, %39 : vector<2x2x896xf32>
    %cst_11 = arith.constant 5.000000e-01 : f32
    %41 = vector.broadcast %cst_11 : f32 to vector<2x2x896xf32>
    %42 = arith.mulf %41, %37 : vector<2x2x896xf32>
    %43 = arith.mulf %42, %37 : vector<2x2x896xf32>
    %cst_12 = arith.constant 5.000000e-01 : f32
    %44 = vector.broadcast %cst_12 : f32 to vector<2x2x896xf32>
    %45 = arith.subf %38, %44 : vector<2x2x896xf32>
    %46 = arith.select %40, %43, %45 : vector<2x2x896xi1>, vector<2x2x896xf32>
    %cst_13 = arith.constant 0.000000e+00 : f32
    %47 = vector.shape_cast %29 : vector<1x2x896xi1> to vector<1x2x896xi1>
    %48 = vector.broadcast %47 : vector<1x2x896xi1> to vector<2x2x896xi1>
    %49 = vector.broadcast %cst_13 : f32 to vector<2x2x896xf32>
    %50 = arith.select %48, %46, %49 : vector<2x2x896xi1>, vector<2x2x896xf32>
    %51 = vector.shape_cast %50 : vector<2x2x896xf32> to vector<1x2x2x896xf32>
    %cst_14 = arith.constant dense<0.000000e+00> : vector<1xf32>
    %52 = vector.multi_reduction <add>, %51, %cst_14 [1, 2, 3] : vector<1x2x2x896xf32> to vector<1xf32>
    %53 = vector.shape_cast %52 : vector<1xf32> to vector<1x1x1x1xf32>
    %54 = vector.extract %53[0, 0, 0, 0] : f32 from vector<1x1x1x1xf32>
    %cst_15 = arith.constant -2.000000e+01 : f32
    %cst_16 = arith.constant 2.000000e+01 : f32
    %55 = vector.broadcast %cst_15 : f32 to vector<2x2x896xf32>
    %56 = arith.maximumf %55, %0 : vector<2x2x896xf32>
    %57 = vector.broadcast %cst_16 : f32 to vector<2x2x896xf32>
    %58 = arith.minimumf %57, %56 : vector<2x2x896xf32>
    %cst_17 = arith.constant 0.000000e+00 : f32
    %cst_18 = arith.constant 1.000000e+00 : f32
    %59 = vector.broadcast %cst_17 : f32 to vector<2x2x896xf32>
    %60 = arith.maximumf %59, %1 : vector<2x2x896xf32>
    %61 = vector.broadcast %cst_18 : f32 to vector<2x2x896xf32>
    %62 = arith.minimumf %61, %60 : vector<2x2x896xf32>
    %cst_19 = arith.constant 0.000000e+00 : f32
    %63 = vector.broadcast %cst_19 : f32 to vector<2x2x896xf32>
    %64 = arith.maximumf %58, %63 : vector<2x2x896xf32>
    %65 = arith.mulf %58, %62 : vector<2x2x896xf32>
    %66 = arith.subf %64, %65 : vector<2x2x896xf32>
    %67 = math.absf %58 : vector<2x2x896xf32>
    %cst_20 = arith.constant 0.000000e+00 : f32
    %68 = vector.broadcast %cst_20 : f32 to vector<2x2x896xf32>
    %69 = arith.subf %68, %67 : vector<2x2x896xf32>
    %70 = math.exp %69 : vector<2x2x896xf32>
    %cst_21 = arith.constant 1.000000e+00 : f32
    %71 = vector.broadcast %cst_21 : f32 to vector<2x2x896xf32>
    %72 = arith.addf %71, %70 : vector<2x2x896xf32>
    %73 = math.log %72 : vector<2x2x896xf32>
    %74 = arith.addf %66, %73 : vector<2x2x896xf32>
    %cst_22 = arith.constant 0.000000e+00 : f32
    %75 = vector.broadcast %cst_22 : f32 to vector<2x2x896xf32>
    %76 = arith.subf %75, %74 : vector<2x2x896xf32>
    %77 = math.exp %76 : vector<2x2x896xf32>
    %cst_23 = arith.constant 1.000000e+00 : f32
    %78 = vector.broadcast %cst_23 : f32 to vector<2x2x896xf32>
    %79 = arith.subf %78, %77 : vector<2x2x896xf32>
    %80 = arith.mulf %79, %79 : vector<2x2x896xf32>
    %cst_24 = arith.constant 5.000000e-01 : f32
    %81 = vector.broadcast %cst_24 : f32 to vector<2x2x896xf32>
    %82 = arith.mulf %81, %80 : vector<2x2x896xf32>
    %83 = arith.mulf %82, %74 : vector<2x2x896xf32>
    %cst_25 = arith.constant 0.000000e+00 : f32
    %84 = vector.shape_cast %34 : vector<1x2x896xi1> to vector<1x2x896xi1>
    %85 = vector.broadcast %84 : vector<1x2x896xi1> to vector<2x2x896xi1>
    %86 = vector.broadcast %cst_25 : f32 to vector<2x2x896xf32>
    %87 = arith.select %85, %83, %86 : vector<2x2x896xi1>, vector<2x2x896xf32>
    %88 = vector.shape_cast %87 : vector<2x2x896xf32> to vector<1x2x2x896xf32>
    %cst_26 = arith.constant dense<0.000000e+00> : vector<1xf32>
    %89 = vector.multi_reduction <add>, %88, %cst_26 [1, 2, 3] : vector<1x2x2x896xf32> to vector<1xf32>
    %90 = vector.shape_cast %89 : vector<1xf32> to vector<1x1x1x1xf32>
    %91 = vector.extract %90[0, 0, 0, 0] : f32 from vector<1x1x1x1xf32>
    %cst_27 = arith.constant -1.000000e+01 : f32
    %cst_28 = arith.constant 1.000000e+01 : f32
    %92 = vector.broadcast %cst_27 : f32 to vector<2x2x896xf32>
    %93 = arith.maximumf %92, %0 : vector<2x2x896xf32>
    %94 = vector.broadcast %cst_28 : f32 to vector<2x2x896xf32>
    %95 = arith.minimumf %94, %93 : vector<2x2x896xf32>
    %cst_29 = arith.constant 0.000000e+00 : f32
    %96 = vector.broadcast %cst_29 : f32 to vector<2x2x896xf32>
    %97 = arith.subf %96, %95 : vector<2x2x896xf32>
    %98 = math.exp %97 : vector<2x2x896xf32>
    %cst_30 = arith.constant 1.000000e+00 : f32
    %99 = vector.broadcast %cst_30 : f32 to vector<2x2x896xf32>
    %100 = arith.addf %99, %98 : vector<2x2x896xf32>
    %cst_31 = arith.constant 1.000000e+00 : f32
    %101 = vector.broadcast %cst_31 : f32 to vector<2x2x896xf32>
    %102 = arith.divf %101, %100 : vector<2x2x896xf32>
    %103 = arith.mulf %102, %1 : vector<2x2x896xf32>
    %cst_32 = arith.constant dense<0.000000e+00> : vector<2x896xf32>
    %104 = vector.multi_reduction <add>, %103, %cst_32 [0] : vector<2x2x896xf32> to vector<2x896xf32>
    %105 = vector.shape_cast %104 : vector<2x896xf32> to vector<1x2x896xf32>
    %cst_33 = arith.constant 1.000000e+00 : f32
    %106 = vector.broadcast %cst_33 : f32 to vector<2x2x896xf32>
    %107 = arith.subf %106, %1 : vector<2x2x896xf32>
    %108 = arith.mulf %102, %107 : vector<2x2x896xf32>
    %cst_34 = arith.constant dense<0.000000e+00> : vector<2x896xf32>
    %109 = vector.multi_reduction <add>, %108, %cst_34 [0] : vector<2x2x896xf32> to vector<2x896xf32>
    %110 = vector.shape_cast %109 : vector<2x896xf32> to vector<1x2x896xf32>
    %cst_35 = arith.constant 1.000000e+00 : f32
    %111 = vector.broadcast %cst_35 : f32 to vector<2x2x896xf32>
    %112 = arith.subf %111, %102 : vector<2x2x896xf32>
    %113 = arith.mulf %112, %1 : vector<2x2x896xf32>
    %cst_36 = arith.constant dense<0.000000e+00> : vector<2x896xf32>
    %114 = vector.multi_reduction <add>, %113, %cst_36 [0] : vector<2x2x896xf32> to vector<2x896xf32>
    %115 = vector.shape_cast %114 : vector<2x896xf32> to vector<1x2x896xf32>
    %116 = arith.addf %105, %110 : vector<1x2x896xf32>
    %cst_37 = arith.constant 9.99999997E-7 : f32
    %117 = vector.broadcast %cst_37 : f32 to vector<1x2x896xf32>
    %118 = arith.addf %116, %117 : vector<1x2x896xf32>
    %119 = arith.divf %105, %118 : vector<1x2x896xf32>
    %120 = arith.addf %105, %115 : vector<1x2x896xf32>
    %cst_38 = arith.constant 9.99999997E-7 : f32
    %121 = vector.broadcast %cst_38 : f32 to vector<1x2x896xf32>
    %122 = arith.addf %120, %121 : vector<1x2x896xf32>
    %123 = arith.divf %105, %122 : vector<1x2x896xf32>
    %cst_39 = arith.constant 1.700000e+01 : f32
    %124 = vector.broadcast %cst_39 : f32 to vector<1x2x896xf32>
    %125 = arith.mulf %124, %119 : vector<1x2x896xf32>
    %126 = arith.mulf %125, %123 : vector<1x2x896xf32>
    %cst_40 = arith.constant 1.600000e+01 : f32
    %127 = vector.broadcast %cst_40 : f32 to vector<1x2x896xf32>
    %128 = arith.mulf %127, %119 : vector<1x2x896xf32>
    %129 = arith.addf %128, %123 : vector<1x2x896xf32>
    %cst_41 = arith.constant 9.99999997E-7 : f32
    %130 = vector.broadcast %cst_41 : f32 to vector<1x2x896xf32>
    %131 = arith.addf %129, %130 : vector<1x2x896xf32>
    %132 = arith.divf %126, %131 : vector<1x2x896xf32>
    %cst_42 = arith.constant 0.000000e+00 : f32
    %133 = vector.broadcast %cst_42 : f32 to vector<1x2x896xf32>
    %134 = arith.select %34, %132, %133 : vector<1x2x896xi1>, vector<1x2x896xf32>
    %135 = vector.shape_cast %134 : vector<1x2x896xf32> to vector<1x1x2x896xf32>
    %cst_43 = arith.constant dense<0.000000e+00> : vector<1xf32>
    %136 = vector.multi_reduction <add>, %135, %cst_43 [1, 2, 3] : vector<1x1x2x896xf32> to vector<1xf32>
    %137 = vector.shape_cast %136 : vector<1xf32> to vector<1x1x1x1xf32>
    %138 = vector.extract %137[0, 0, 0, 0] : f32 from vector<1x1x1x1xf32>
    %139 = tpu.iota {dimensions = array<i32: 2>} : vector<1x1x128xi32>
    %c0_i32_44 = arith.constant 0 : i32
    %140 = vector.broadcast %c0_i32_44 : i32 to vector<1x1x128xi32>
    %141 = arith.cmpi eq, %139, %140 : vector<1x1x128xi32>
    %142 = arith.extui %141 : vector<1x1x128xi1> to vector<1x1x128xi32>
    %143 = arith.sitofp %142 : vector<1x1x128xi32> to vector<1x1x128xf32>
    %144 = vector.broadcast %54 : f32 to vector<1x1x128xf32>
    %145 = arith.mulf %144, %143 : vector<1x1x128xf32>
    %c1_i32_45 = arith.constant 1 : i32
    %146 = vector.broadcast %c1_i32_45 : i32 to vector<1x1x128xi32>
    %147 = arith.cmpi eq, %139, %146 : vector<1x1x128xi32>
    %148 = arith.extui %147 : vector<1x1x128xi1> to vector<1x1x128xi32>
    %149 = arith.sitofp %148 : vector<1x1x128xi32> to vector<1x1x128xf32>
    %150 = vector.broadcast %91 : f32 to vector<1x1x128xf32>
    %151 = arith.mulf %150, %149 : vector<1x1x128xf32>
    %152 = arith.addf %145, %151 : vector<1x1x128xf32>
    %c2_i32_46 = arith.constant 2 : i32
    %153 = vector.broadcast %c2_i32_46 : i32 to vector<1x1x128xi32>
    %154 = arith.cmpi eq, %139, %153 : vector<1x1x128xi32>
    %155 = arith.extui %154 : vector<1x1x128xi1> to vector<1x1x128xi32>
    %156 = arith.sitofp %155 : vector<1x1x128xi32> to vector<1x1x128xf32>
    %157 = vector.broadcast %138 : f32 to vector<1x1x128xf32>
    %158 = arith.mulf %157, %156 : vector<1x1x128xf32>
    %159 = arith.addf %152, %158 : vector<1x1x128xf32>
    %c0_47 = arith.constant 0 : index
    %c0_48 = arith.constant 0 : index
    %c0_49 = arith.constant 0 : index
    %160 = vector.load %arg3[%c0_47, %c0_48, %c0_49] : memref<1x1x128xf32, #tpu.memory_space<vmem>>, vector<1x1x128xf32>
    tpu.vector_store %arg3[%c0_47, %c0_48, %c0_49], %159 {strides = array<i32>} : memref<1x1x128xf32, #tpu.memory_space<vmem>>, vector<1x1x128xf32>,
    return
  }
  func.func @transform_0(%arg0: i32) -> (i32, i32, i32) {
    %c0_i32 = arith.constant 0 : i32
    %c0_i32_0 = arith.constant 0 : i32
    %c0_i32_1 = arith.constant 0 : i32
    return %c0_i32, %arg0, %c0_i32_0 : i32, i32, i32
  }
  func.func @transform_1(%arg0: i32) -> (i32, i32, i32) {
    %c0_i32 = arith.constant 0 : i32
    %c0_i32_0 = arith.constant 0 : i32
    %c0_i32_1 = arith.constant 0 : i32
    return %c0_i32, %arg0, %c0_i32_0 : i32, i32, i32
  }
  func.func @transform_2(%arg0: i32) -> (i32, i32, i32) {
    %c0_i32 = arith.constant 0 : i32
    %c0_i32_0 = arith.constant 0 : i32
    %c0_i32_1 = arith.constant 0 : i32
    return %arg0, %c0_i32, %c0_i32_0 : i32, i32, i32
  }
}

</mosaic_0001>

<bundles_post_ra>
// kernel: tpu_custom_call.1
= control target key start
LH: loop header
LB: loop body
LE: loop exit
PB: predicated region body
PF: predicated region fallthrough
CT: control target
= control target key end

     0   :  { %7 = vsyncpa [#allocation3], 0  ;;  %s2041_s0 = inlined_call_operand.hbm [shape: f32[2,2,896], index: 0, kind: input, shape index: {}]   ;;  %s2042_s1 = inlined_call_operand.hbm [shape: f32[2,2,896], index: 1, kind: input, shape index: {}]   ;;  %s2043_s2 = inlined_call_operand.hbm [shape: f32[1,1,128], index: 2, kind: output, shape index: {}]  }
   0x1   :  { %8 = vsyncpa [#allocation6], 0 }
   0x2   :  { %9 = vsyncpa [#allocation4], 0  ;;  %s1396_s9 = smov [#allocation2]  }
   0x3   :  { %s15_s10 = sshll.u32 %s1396_s9, 4  ;;  %s16_s10 = int_to_ptr.vmem [resolvable:$true] %s15_s10 }
   0x4   :  { %s1338_s11 = scalar_lea.vmem %s16_s10, 448  ;;  %p1343_p1 = scmp.lt.s32.totalorder %s16_s10, %s16_s10 }
   0x5   :  { %p1339_p0 = scmp.ne.s32.totalorder %s16_s10, %s1338_s11  ;;  %p1344_p2 = scmp.lt.s32.totalorder %s1338_s11, %s1338_s11 }
   0x7   :  { %p1345_p3 = por %p1344_p2, %p1343_p1 }
   0x9   :  { %p1346_p4 = pnand %p1345_p3, %p1339_p0 }
   0xb   :  { %1349 = shalt.err (!%p1346_p4)
}
   0xc   :  { %s1397_s12 = smov 224   ;;  %s1398_s13 = smov 14  }
   0xd   :  { %21 = dma.hbm_to_vmem [thread:$0]  %s2041_s0, 448, %s16_s10, [#allocation3], %s1397_s12, %s1397_s12, %s1398_s13  }
   0xe   :  { %s1399_s16 = smov [#allocation5]  }
   0xf   :  { %s27_s17 = sshll.u32 %s1399_s16, 4  ;;  %s28_s17 = int_to_ptr.vmem [resolvable:$true] %s27_s17 }
  0x10   :  { %s1358_s18 = scalar_lea.vmem %s28_s17, 448  ;;  %p1363_p6 = scmp.lt.s32.totalorder %s28_s17, %s28_s17 }
  0x11   :  { %p1359_p5 = scmp.ne.s32.totalorder %s28_s17, %s1358_s18  ;;  %p1364_p7 = scmp.lt.s32.totalorder %s1358_s18, %s1358_s18 }
  0x13   :  { %p1365_p8 = por %p1364_p7, %p1363_p6 }
  0x15   :  { %p1366_p9 = pnand %p1365_p8, %p1359_p5 }
  0x17   :  { %1369 = shalt.err (!%p1366_p9)
}
  0x18   :  { %33 = dma.hbm_to_vmem [thread:$0]  %s2042_s1, 448, %s28_s17, [#allocation6], %s1397_s12, %s1397_s12, %s1398_s13  }
  0x19   :  { %1390 = dma.done.wait [#allocation3], 448  }
  0x1a   :  { %1391 = vsyncadd [#allocation3], 4294966848 }
  0x1b   :  { %1392 = dma.done.wait [#allocation6], 448  }
  0x1c   :  { %1393 = vsyncadd [#allocation6], 4294966848  ;;  %v48_v0 = vlaneseq  ;;  %v1400_v12 = vmov 0   ;;  %v1401_v21 = vmov 1983009808   ;;  %v1460_v39 = vld [vmem:[#allocation2] sm:$0xff] }
  0x1d   :  { %v1446_v22 = vunpack.c.l.s4 %v1401_v21  ;;  %v1462_v40 = vld [vmem:[#allocation5] sm:$0xff]  ;;  %v1469_v45 = vld [vmem:[#allocation2 + $0x8] sm:$0x3f]  ;;  %v1515_v21 = vld [vmem:[#allocation5 + $0x16] sm:$0x3f]  ;;  %s1403_s22 = smov [#allocation7]  }
  0x1e   :  { %v1425_v1 = vand.u32 127, %v48_v0  ;;  %v1458_v38 = vshrl.u32 %v48_v0, 7  ;;  %v253_v49 = vsub.f32 %v1460_v39, %v1462_v40  ;;  %v1473_v50 = vld [vmem:[#allocation5 + $0x8] sm:$0x3f]  ;;  %s1195_s23 = sshll.u32 %s1403_s22, 4  ;;  %s1196_s23 = int_to_ptr.vmem [resolvable:$true] %s1195_s23 }
  0x1f   :  { %v306_v44 = vunpack.c.0.s8 %v1446_v22  ;;  %v254_v57 = vsub.f32 %v1469_v45, %v1473_v50  ;;  %s1370_s24 = scalar_lea.vmem %s1196_s23, 16  ;;  %s1374_s25 = scalar_lea.vmem %s1196_s23, 32 }
  0x20   :  { %v50_v2 = vadd.s32 128, %v1425_v1  ;;  %v51_v3 = vadd.s32 256, %v1425_v1  ;;  %v52_v4 = vadd.s32 384, %v1425_v1  ;;  %v53_v11 = vadd.s32 512, %v1425_v1  ;;  %p1371_p10 = scmp.ne.s32.totalorder %s1196_s23, %s1370_s24  ;;  %p1375_p11 = scmp.lt.s32.totalorder %s1196_s23, %s1196_s23 }
  0x21   :  { %v1431_v5 = vmul.u32.u64.low 2454267026, %v1425_v1  ;;  %v1432_v6 = vmul.u32.u64.high 2454267026, %v1425_v1, %v1431_v5  ;;  %v54_v26 = vadd.s32 640, %v1425_v1  ;;  %v1455_v32 = vadd.s32 768, %v1425_v1  ;;  %p1376_p12 = scmp.lt.s32.totalorder %s1374_s25, %s1370_s24 }
  0x22   :  { %v1434_v7 = vmul.u32.u64.low 2454267026, %v50_v2  ;;  %v1435_v8 = vmul.u32.u64.high 2454267026, %v50_v2, %v1434_v7  ;;  %v1437_v9 = vmul.u32.u64.low 2454267026, %v51_v3  ;;  %v1438_v10 = vmul.u32.u64.high 2454267026, %v51_v3, %v1437_v9 }
  0x23   :  { %vm62_vm0 = vc.u32 %v1431_v5, 2454267026  ;;  %v1442_v16 = vmul.u32.u64.low 2454267026, %v52_v4  ;;  %v1443_v17 = vmul.u32.u64.high 2454267026, %v52_v4, %v1442_v16  ;;  %p1377_p13 = por %p1376_p12, %p1375_p11 }
  0x24   :  { %v63_v13 = vsel %vm62_vm0, 1, %v1400_v12  ;;  %vm76_vm1 = vc.u32 %v1434_v7, 2454267026  ;;  %vm90_vm2 = vc.u32 %v1437_v9, 2454267026  ;;  %v1496_v9 = vld [vmem:[#allocation2 + $0xe] sm:$0xff] }
  0x25   :  { %v64_v14 = vadd.s32 %v1432_v6, %v63_v13  ;;  %v77_v15 = vsel %vm76_vm1, 1, %v1400_v12  ;;  %v91_v20 = vsel %vm90_vm2, 1, %v1400_v12  ;;  %vm104_vm3 = vc.u32 %v1442_v16, 2454267026  ;;  %p1378_p0 = pnand %p1377_p13, %p1371_p10 }
  0x26   :  { %v78_v19 = vadd.s32 %v1435_v8, %v77_v15  ;;  %v92_v23 = vadd.s32 %v1438_v10, %v91_v20  ;;  %v1449_v24 = vmul.u32.u64.low 2454267026, %v53_v11  ;;  %v1450_v25 = vmul.u32.u64.high 2454267026, %v53_v11, %v1449_v24  ;;  %v1498_v10 = vld [vmem:[#allocation5 + $0xe] sm:$0xff]  ;;  %v1513_v20 = vld [vmem:[#allocation2 + $0x16] sm:$0x3f] }
  0x27   :  { %v65_v18 = vshrl.u32 %v64_v14, 2  ;;  %v105_v29 = vsel %vm104_vm3, 1, %v1400_v12  ;;  %v1465_v42 = vmul.u32.u64.low 2454267026, %v54_v26  ;;  %v1466_v43 = vmul.u32.u64.high 2454267026, %v54_v26, %v1465_v42 }
  0x28   :  { %v79_v28 = vshrl.u32 %v78_v19, 2  ;;  %v93_v30 = vshrl.u32 %v92_v23, 2  ;;  %v106_v31 = vadd.s32 %v1443_v17, %v105_v29  ;;  %vm118_vm4 = vc.u32 %v1449_v24, 2454267026 }
  0x29   :  { %v66_v27 = vmul.u32 7, %v65_v18  ;;  %v119_v34 = vsel %vm118_vm4, 1, %v1400_v12  ;;  %vm132_vm5 = vc.u32 %v1465_v42, 2454267026  ;;  %v1503_v14 = vsub.s32 %v306_v44, %v1458_v38 }
  0x2a   :  { %v80_v33 = vmul.u32 7, %v79_v28  ;;  %v94_v35 = vmul.u32 7, %v93_v30  ;;  %v107_v36 = vshrl.u32 %v106_v31, 2  ;;  %v120_v37 = vadd.s32 %v1450_v25, %v119_v34 }
  0x2b   :  { %v67_v41 = vsub.s32 %v1425_v1, %v66_v27  ;;  %v1476_v52 = vmul.u32.u64.low 2454267026, %v1455_v32  ;;  %v1477_v53 = vmul.u32.u64.high 2454267026, %v1455_v32, %v1476_v52  ;;  %v133_v56 = vsel %vm132_vm5, 1, %v1400_v12 }
  0x2c   :  { %v81_v46 = vsub.s32 %v50_v2, %v80_v33  ;;  %v108_v47 = vmul.u32 7, %v107_v36  ;;  %v121_v48 = vshrl.u32 %v120_v37, 2  ;;  %v95_v51 = vsub.s32 %v51_v3, %v94_v35 }
  0x2d   :  { %v134_v58 = vadd.s32 %v1466_v43, %v133_v56  ;;  %vm146_vm6 = vc.u32 %v1476_v52, 2454267026  ;;  %vm154_vm7 = vcmp.ne.s32.totalorder %v67_v41, 0  ;;  %vm161_vm8 = vcmp.lt.s32.totalorder %v67_v41, 0 }
  0x2e   :  { %v109_v54 = vsub.s32 %v52_v4, %v108_v47  ;;  %v122_v55 = vmul.u32 7, %v121_v48  ;;  %v147_v60 = vsel %vm146_vm6, 1, %v1400_v12  ;;  %vm155_vm9 = vcmp.ne.s32.totalorder %v81_v46, 0  ;;  %vm1483_vm15 = vmand %vm161_vm8, %vm154_vm7 }
  0x2f   :  { %vm162_vm10 = vcmp.lt.s32.totalorder %v81_v46, 0  ;;  %v135_v61 = vshrl.u32 %v134_v58, 2  ;;  %v148_v62 = vadd.s32 %v1477_v53, %v147_v60  ;;  %vm156_vm11 = vcmp.ne.s32.totalorder %v95_v51, 0 }
  0x30   :  { %v123_v59 = vsub.s32 %v53_v11, %v122_v55  ;;  %vm163_vm12 = vcmp.lt.s32.totalorder %v95_v51, 0  ;;  %vm157_vm13 = vcmp.ne.s32.totalorder %v109_v54, 0  ;;  %vm164_vm14 = vcmp.lt.s32.totalorder %v109_v54, 0  ;;  %vm1488_vm2 = vmand %vm162_vm10, %vm155_vm9 }
  0x31   :  { %v175_v0 = vadd.s32 7, %v67_v41  ;;  %v176_v2 = vadd.s32 7, %v81_v46  ;;  %v136_v3 = vmul.u32 7, %v135_v61  ;;  %v149_v4 = vshrl.u32 %v148_v62, 2  ;;  %vm1492_vm3 = vmand %vm163_vm12, %vm156_vm11 }
  0x32   :  { %vm158_vm0 = vcmp.ne.s32.totalorder %v123_v59, 0  ;;  %vm165_vm1 = vcmp.lt.s32.totalorder %v123_v59, 0  ;;  %v177_v7 = vadd.s32 7, %v95_v51  ;;  %v178_v8 = vadd.s32 7, %v109_v54  ;;  %vm171_vm4 = vmand %vm164_vm14, %vm157_vm13 }
  0x33   :  { %v137_v11 = vsub.s32 %v54_v26, %v136_v3  ;;  %v150_v12 = vmul.u32 7, %v149_v4  ;;  %v179_v13 = vadd.s32 7, %v123_v59  ;;  %vm1505_vm5 = vmand %vm165_vm1, %vm158_vm0  ;;  %v182_v16 = vsel %vm1483_vm15, %v175_v0, %v67_v41 }
  0x34   :  { %v255_v17 = vsub.f32 %v1496_v9, %v1498_v10  ;;  %v257_v18 = vmul.f32 0.0078125, %v253_v49  ;;  %v258_v19 = vmul.f32 0.0078125, %v254_v57  ;;  %v183_v23 = vsel %vm1488_vm2, %v176_v2, %v81_v46 }
  0x35   :  { %v151_v22 = vsub.s32 %v1455_v32, %v150_v12  ;;  %vm159_vm6 = vcmp.ne.s32.totalorder %v137_v11, 0  ;;  %vm166_vm7 = vcmp.lt.s32.totalorder %v137_v11, 0  ;;  %v184_v24 = vsel %vm1492_vm3, %v177_v7, %v95_v51 }
  0x36   :  { %v1522_v25 = vsel %vm171_vm4, %v178_v8, %v109_v54  ;;  %vm194_vm8 = vcmp.lt.s32.totalorder %v1458_v38, 2  ;;  %v256_v26 = vsub.f32 %v1513_v20, %v1515_v21  ;;  %v1529_v27 = vsel %vm1505_vm5, %v179_v13, %v123_v59  ;;  %vm1531_vm12 = vmand %vm166_vm7, %vm159_vm6 }
  0x37   :  { %vm160_vm9 = vcmp.ne.s32.totalorder %v151_v22, 0  ;;  %vm167_vm10 = vcmp.lt.s32.totalorder %v151_v22, 0  ;;  %vm195_vm11 = vcmp.lt.s32.totalorder %v182_v16, 4  ;;  %v180_v29 = vadd.s32 7, %v137_v11 }
  0x38   :  { %v181_v30 = vadd.s32 7, %v151_v22  ;;  %vm196_vm13 = vcmp.lt.s32.totalorder %v183_v23, 4  ;;  %v259_v31 = vmul.f32 0.0078125, %v255_v17  ;;  %vm1535_vm14 = vmand %vm167_vm10, %vm160_vm9  ;;  %vm225_vm15 = vcmp.ge.s32.totalorder %v182_v16, 4 }
  0x39   :  { %v261_v33 = vand.u32 2147483647, %v257_v18  ;;  %v262_v34 = vand.u32 2147483647, %v258_v19  ;;  %v269_v35 = vmul.f32 0.5, %v257_v18  ;;  %vm1541_vm0 = vmand %vm194_vm8, %vm195_vm11  ;;  %vm226_vm1 = vcmp.ge.s32.totalorder %v183_v23, 4 }
  0x3a   :  { %vm227_vm2 = vcmp.ge.s32.totalorder %v184_v24, 4  ;;  %vm228_vm3 = vcmp.ge.s32.totalorder %v1522_v25, 4  ;;  %v260_v37 = vmul.f32 0.0078125, %v256_v26  ;;  %vm1548_vm4 = vmand %vm194_vm8, %vm196_vm13  ;;  %vm229_vm5 = vcmp.ge.s32.totalorder %v1529_v27, 4 }
  0x3b   :  { %v263_v42 = vand.u32 2147483647, %v259_v31  ;;  %v270_v43 = vmul.f32 0.5, %v258_v19  ;;  %v271_v44 = vmul.f32 0.5, %v259_v31  ;;  %v187_v46 = vsel %vm1531_vm12, %v180_v29, %v137_v11  ;;  %vm1560_vm6 = vmand %vm194_vm8, %vm225_vm15 }
  0x3c   :  { %v188_v47 = vsel %vm1535_vm14, %v181_v30, %v151_v22  ;;  %vm265_vm7 = vcmp.lt.f32.partialorder %v261_v33, 1.0  ;;  %v273_v49 = vmul.f32 %v269_v35, %v257_v18  ;;  %vm1564_vm9 = vcmp.lt.f32.partialorder %v262_v34, 1.0  ;;  %vm1571_vm10 = vmand %vm194_vm8, %vm226_vm1 }
  0x3d   :  { %v274_v52 = vmul.f32 %v270_v43, %v258_v19  ;;  %v1205_v53 = vadd.f32 -0.5, %v261_v33  ;;  %v1206_v54 = vadd.f32 -0.5, %v262_v34  ;;  %vm197_vm11 = vcmp.lt.s32.totalorder %v184_v24, 4  ;;  %vm1578_vm14 = vmand %vm194_vm8, %vm227_vm2 }
  0x3e   :  { %vm230_vm12 = vcmp.ge.s32.totalorder %v187_v46, 4  ;;  %vm231_vm13 = vcmp.ge.s32.totalorder %v188_v47, 4  ;;  %v264_v56 = vand.u32 2147483647, %v260_v37  ;;  %v272_v58 = vmul.f32 0.5, %v260_v37  ;;  %vm1586_vm15 = vmand %vm194_vm8, %vm228_vm3 }
  0x3f   :  { %v275_v59 = vmul.f32 %v271_v44, %v259_v31  ;;  %v1207_v60 = vadd.f32 -0.5, %v263_v42  ;;  %v281_v61 = vsel %vm265_vm7, %v273_v49, %v1205_v53  ;;  %vm267_vm1 = vcmp.lt.f32.partialorder %v263_v42, 1.0  ;;  %vm1597_vm2 = vmand %vm194_vm8, %vm229_vm5 }
  0x40   :  { %v282_v63 = vsel %vm1564_vm9, %v274_v52, %v1206_v54  ;;  %v303_v0 = vcombine.high %v281_v61, %v281_v61  ;;  %v310_v2 = vrot.slane %v281_v61, %v1503_v14  ;;  %v2073_v3 = vmov 0  ;;  %vm1605_vm7 = vmand %vm194_vm8, %vm230_vm12 }
  0x41   :  { %v2074_v3 = vsel %vm1597_vm2, 4294967295, %v2073_v3  ;;  %vm198_vm3 = vcmp.lt.s32.totalorder %v1522_v25, 4  ;;  %v2075_v4 = vmov 0  ;;  %vm1614_vm5 = vmand %vm194_vm8, %vm231_vm13  ;;  %v2077_v7 = vmov 0 }
  0x42   :  { %v2076_v4 = vsel %vm1605_vm7, 4294967295, %v2075_v4  ;;  %v317_v5 = vrot.slane %v303_v0, %v1503_v14  ;;  %v318_v6 = vcombine.high %v310_v2, %v310_v2  ;;  %v2078_v7 = vsel %vm1614_vm5, 4294967295, %v2077_v7  ;;  %vm1621_vm2 = vmand %vm194_vm8, %vm197_vm11 }
  0x43   :  { %v276_v11 = vmul.f32 %v272_v58, %v260_v37  ;;  %v1208_v12 = vadd.f32 -0.5, %v264_v56  ;;  %v283_v13 = vsel %vm267_vm1, %v275_v59, %v1207_v60  ;;  %v327_v15 = vrot.slane %v282_v63, %v1503_v14  ;;  %vm1628_vm12 = vmand %vm194_vm8, %vm198_vm3 }
  0x44   :  { %vm268_vm13 = vcmp.lt.f32.partialorder %v264_v56, 1.0  ;;  %v319_v17 = vcombine.high %v317_v5, %v317_v5  ;;  %v320_v18 = vcombine.high %v282_v63, %v282_v63  ;;  %v336_v19 = vcombine.high %v283_v13, %v283_v13 }
  0x45   :  { %vm200_vm9 = vcmp.lt.s32.totalorder %v187_v46, 4  ;;  %v383_v22 = vsel %vm1541_vm0, %v310_v2, 0.0  ;;  %v384_v23 = vsel %vm1548_vm4, %v318_v6, 0.0  ;;  %vm201_vm11 = vcmp.lt.s32.totalorder %v188_v47, 4 }
  0x46   :  { %vm2083_vm1 = vcmp.lt.s32.totalorder %v1529_v27, 4  ;;  %v385_v25 = vsel %vm1621_vm2, %v317_v5, 0.0  ;;  %vm397_vm5 = vcmask 1041408   ;;  %v284_v26 = vsel %vm268_vm13, %v276_v11, %v1208_v12  ;;  %vm1651_vm7 = vmand %vm194_vm8, %vm200_vm9 }
  0x47   :  { %vm1640_vm3 = vmand %vm194_vm8, %vm2083_vm1  ;;  %v335_v28 = vcombine.high %v327_v15, %v327_v15  ;;  %v343_v29 = vrot.slane %v283_v13, %v1503_v14  ;;  %v386_v30 = vsel %vm1628_vm12, %v319_v17, 0.0  ;;  %v334_v31 = vrot.slane %v320_v18, %v1503_v14 }
  0x48   :  { %v350_v32 = vrot.slane %v336_v19, %v1503_v14  ;;  %v398_v33 = vsel %vm397_vm5, %v383_v22, 0.0  ;;  %v399_v34 = vsel %vm397_vm5, %v384_v23, 0.0  ;;  %vm1661_vm13 = vmand %vm194_vm8, %vm201_vm11  ;;  %v387_v37 = vsel %vm1640_vm3, %v327_v15, 0.0 }
  0x49   :  { %v400_v42 = vadd.f32 %v399_v34, %v398_v33  ;;  %v401_v43 = vsel %vm397_vm5, %v385_v25, 0.0  ;;  %v1669_v44 = vclamps-f32 %v1460_v39, 20.0  ;;  %v403_v46 = vsel %vm397_vm5, %v386_v30, 0.0 }
  0x4a   :  { %v360_v47 = vrot.slane %v284_v26, %v1503_v14  ;;  %v388_v38 = vsel %vm1651_vm7, %v335_v28, 0.0  ;;  %v351_v51 = vcombine.high %v343_v29, %v343_v29  ;;  %v352_v52 = vcombine.high %v350_v32, %v350_v32 }
  0x4b   :  { %v402_v49 = vadd.f32 %v401_v43, %v400_v42  ;;  %v389_v53 = vsel %vm1661_vm13, %v334_v31, 0.0  ;;  %v405_v54 = vsel %vm397_vm5, %v387_v37, 0.0  ;;  %v462_v58 = vand.u32 2147483647, %v1669_v44 }
  0x4c   :  { %v1213_v59 = vclamps-f32 %v1460_v39, 10.0  ;;  %v1214_v60 = vclamps-f32 %v1469_v45, 10.0  ;;  %v390_v61 = vsel %vm1541_vm0, %v343_v29, 0.0  ;;  %v407_v63 = vsel %vm397_vm5, %v388_v38, 0.0 }
  0x4d   :  { %v404_v56 = vadd.f32 %v403_v46, %v402_v49  ;;  %v1215_v0 = vclamps-f32 %v1496_v9, 10.0  ;;  %v1216_v2 = vclamps-f32 %v1513_v20, 10.0  ;;  %v466_v6 = vsub.f32 0.0, %v462_v58 }
  0x4e   :  { %v678_v11 = vsub.f32 0.0, %v1213_v59  ;;  %v679_v12 = vsub.f32 0.0, %v1214_v60  ;;  %v391_v13 = vsel %vm1548_vm4, %v351_v51, 0.0  ;;  %v409_v39 = vsel %vm397_vm5, %v389_v53, 0.0 }
  0x4f   :  { %v406_v5 = vadd.f32 %v405_v54, %v404_v56  ;;  %v680_v15 = vsub.f32 0.0, %v1215_v0  ;;  %v681_v17 = vsub.f32 0.0, %v1216_v2  ;;  %v470_v36 = vmul.f32 1.442695, %v466_v6 }
  0x50   :  { %v682_v19 = vmul.f32 1.442695, %v678_v11  ;;  %v684_v22 = vmul.f32 1.442695, %v679_v12  ;;  %v353_v23 = vcombine.high %v284_v26, %v284_v26  ;;  %v411_v25 = vsel %vm397_vm5, %v390_v61, 0.0 }
  0x51   :  { %v408_v18 = vadd.f32 %v407_v63, %v406_v5  ;;  %v1691_v28 = vclamps-f32 %v1469_v45, 20.0  ;;  %v686_v29 = vmul.f32 1.442695, %v680_v15  ;;  %v392_v30 = vsel %vm1621_vm2, %v350_v32, 0.0 }
  0x52   :  { %1248 = vpow2.f32 %v470_v36  ;;  %v688_v31 = vmul.f32 1.442695, %v681_v17  ;;  %v368_v33 = vcombine.high %v360_v47, %v360_v47  ;;  %v413_v34 = vsel %vm397_vm5, %v391_v13, 0.0 }
  0x53   :  { %v410_v41 = vadd.f32 %v409_v39, %v408_v18  ;;  %v1697_v37 = vclamps-f32 %v1496_v9, 20.0  ;;  %1250 = vpow2.f32 %v682_v19  ;;  %v393_v26 = vsel %vm1628_vm12, %v352_v52, 0.0 }
  0x54   :  { %1252 = vpow2.f32 %v684_v22  ;;  %v1702_v45 = vclamps-f32 %v1513_v20, 20.0  ;;  %v367_v8 = vrot.slane %v353_v23, %v1503_v14  ;;  %v415_v32 = vsel %vm397_vm5, %v392_v30, 0.0 }
  0x55   :  { %v412_v42 = vadd.f32 %v411_v25, %v410_v41  ;;  %1254 = vpow2.f32 %v686_v29  ;;  %v394_v43 = vsel %vm1640_vm3, %v360_v47, 0.0  ;;  %v463_v9 = vand.u32 2147483647, %v1691_v28 }
  0x56   :  { %1256 = vpow2.f32 %v688_v31  ;;  %v417_v16 = vsel %vm397_vm5, %v393_v26, 0.0  ;;  %v464_v38 = vand.u32 2147483647, %v1697_v37  ;;  %v395_v20 = vsel %vm1651_vm7, %v368_v33, 0.0 }
  0x57   :  { %v414_v46 = vadd.f32 %v413_v34, %v412_v42  ;;  %v465_v51 = vand.u32 2147483647, %v1702_v45  ;;  %v467_v52 = vsub.f32 0.0, %v463_v9  ;;  %v419_v53 = vsel %vm397_vm5, %v394_v43, 0.0 }
  0x58   :  { %v468_v54 = vsub.f32 0.0, %v464_v38  ;;  %v396_v24 = vsel %vm1661_vm13, %v367_v8, 0.0  ;;  %v421_v59 = vsel %vm397_vm5, %v395_v20, 0.0  ;;  %v442_v39 = vmax.f32 %v1462_v40, 0.0 }
  0x59   :  { %v416_v49 = vadd.f32 %v415_v32, %v414_v46  ;;  %v469_v56 = vsub.f32 0.0, %v465_v51  ;;  %v472_v58 = vmul.f32 1.442695, %v467_v52  ;;  %v423_v63 = vsel %vm397_vm5, %v396_v24, 0.0 }
  0x5a   :  { %v474_v60 = vmul.f32 1.442695, %v468_v54  ;;  %v443_v19 = vmax.f32 %v1473_v50, 0.0  ;;  %v444_v22 = vmax.f32 %v1498_v10, 0.0  ;;  %v445_v23 = vmax.f32 %v1515_v21, 0.0 }
  0x5b   :  { %v418_v47 = vadd.f32 %v417_v16, %v416_v49  ;;  %1258 = vpow2.f32 %v472_v58  ;;  %v476_v27 = vmul.f32 1.442695, %v469_v56  ;;  %v446_v25 = vmin.f32 %v442_v39, 1.0 }
  0x5c   :  { %1260 = vpow2.f32 %v474_v60  ;;  %v447_v29 = vmin.f32 %v443_v19, 1.0  ;;  %v448_v41 = vmin.f32 %v444_v22, 1.0  ;;  %v449_v31 = vmin.f32 %v445_v23, 1.0 }
  0x5d   :  { %v420_v61 = vadd.f32 %v419_v53, %v418_v47  ;;  %1262 = vpow2.f32 %v476_v27  ;;  %v450_v34 = vmax.f32 %v1669_v44, 0.0  ;;  %v454_v26 = vmul.f32 %v1669_v44, %v446_v25 }
  0x5e   :  { %v811_v32 = vsub.f32 1.0, %v1462_v40  ;;  %v451_v43 = vmax.f32 %v1691_v28, 0.0  ;;  %v452_v9 = vmax.f32 %v1697_v37, 0.0  ;;  %v455_v16 = vmul.f32 %v1691_v28, %v447_v29 }
  0x5f   :  { %v422_v0 = vadd.f32 %v421_v59, %v420_v61  ;;  %v1249_v2 = vpop.eup %1248  ;;  %v453_v20 = vmax.f32 %v1702_v45, 0.0  ;;  %v456_v49 = vmul.f32 %v1697_v37, %v448_v41  ;;  %v457_v51 = vmul.f32 %v1702_v45, %v449_v31 }
  0x60   :  { %v1251_v5 = vpop.eup %1250  ;;  %v478_v11 = vadd.f32 1.0, %v1249_v2  ;;  %v458_v44 = vsub.f32 %v450_v34, %v454_v26  ;;  %v812_v52 = vsub.f32 1.0, %v1473_v50  ;;  %v813_v54 = vsub.f32 1.0, %v1498_v10 }
  0x61   :  { %v424_v6 = vadd.f32 %v423_v63, %v422_v0  ;;  %v1253_v35 = vpop.eup %1252  ;;  %v690_v12 = vadd.f32 1.0, %v1251_v5  ;;  %v814_v28 = vsub.f32 1.0, %v1515_v21  ;;  %v459_v56 = vsub.f32 %v451_v43, %v455_v16 }
  0x62   :  { %v1255_v13 = vpop.eup %1254  ;;  %1264 = vlog2.f32 %v478_v11  ;;  %v691_v15 = vadd.f32 1.0, %v1253_v35  ;;  %v460_v37 = vsub.f32 %v452_v9, %v456_v49  ;;  %v461_v61 = vsub.f32 %v453_v20, %v457_v51 }
  0x63   :  { %425 = vadd.xlane.f32.xlu0 %v424_v6  ;;  %v1257_v17 = vpop.eup %1256  ;;  %v692_v18 = vadd.f32 1.0, %v1255_v13  ;;  %1266 = vrcp.f32 %v690_v12  ;;  %vm2090_vm8 = vnez %v2074_v3  ;;  %vm2091_vm0 = vnez %v2076_v4 }
  0x64   :  { %v693_v36 = vadd.f32 1.0, %v1257_v17  ;;  %1268 = vrcp.f32 %v691_v15  ;;  %vm2092_vm4 = vnez %v2078_v7 }
  0x65   :  { %1270 = vrcp.f32 %v692_v18 }
  0x66   :  { %1272 = vrcp.f32 %v693_v36 }
  0x68   :  { %v1259_v30 = vpop.eup %1258 }
  0x69   :  { %v1261_v33 = vpop.eup %1260  ;;  %v479_v42 = vadd.f32 1.0, %v1259_v30 }
  0x6a   :  { %v1263_v8 = vpop.eup %1262  ;;  %v480_v46 = vadd.f32 1.0, %v1261_v33 }
  0x6b   :  { %v481_v38 = vadd.f32 1.0, %v1263_v8  ;;  %1274 = vlog2.f32 %v479_v42 }
  0x6c   :  { %1276 = vlog2.f32 %v480_v46 }
  0x6d   :  { %1278 = vlog2.f32 %v481_v38 }
  0x6f   :  { %v1265_v53 = vpop.eup %1264 }
  0x70   :  { %v1267_v24 = vpop.eup %1266  ;;  %v483_v47 = vmul.f32 0.6931472, %v1265_v53 }
  0x71   :  { %v1269_v58 = vpop.eup %1268  ;;  %v1735_v59 = vmul.f32 %v1267_v24, %v811_v32  ;;  %v924_v60 = vsub.f32 1.0, %v1267_v24  ;;  %v702_v2 = vmul.f32 %v1267_v24, %v1462_v40 }
  0x72   :  { %v1271_v45 = vpop.eup %1270  ;;  %v1737_v27 = vadd.f32 %v483_v47, %v458_v44  ;;  %v1739_v63 = vmul.f32 %v1269_v58, %v812_v52  ;;  %v925_v0 = vsub.f32 1.0, %v1269_v58  ;;  %v703_v12 = vmul.f32 %v1269_v58, %v1473_v50 }
  0x73   :  { %v1273_v5 = vpop.eup %1272  ;;  %v1742_v6 = vmul.f32 %v1271_v45, %v813_v54  ;;  %v926_v11 = vsub.f32 1.0, %v1271_v45  ;;  %v1745_v35 = vmul.f32 %v924_v60, %v1462_v40  ;;  %v704_v17 = vmul.f32 %v1271_v45, %v1498_v10 }
  0x74   :  { %v494_v13 = vsub.f32 0.0, %v1737_v27  ;;  %v1749_v39 = vmul.f32 %v1273_v5, %v814_v28  ;;  %v927_v15 = vsub.f32 1.0, %v1273_v5  ;;  %v1759_v19 = vmul.f32 %v925_v0, %v1473_v50 }
  0x75   :  { %v856_v18 = vcombine.high %v1742_v6, %v1742_v6  ;;  %v1756_v36 = vrot.slane %v1742_v6, %v1503_v14  ;;  %v1762_v40 = vmul.f32 %v926_v11, %v1498_v10  ;;  %v705_v25 = vmul.f32 %v1273_v5, %v1515_v21 }
  0x76   :  { %v498_v22 = vmul.f32 1.442695, %v494_v13  ;;  %v1765_v23 = vmul.f32 %v927_v15, %v1515_v21  ;;  %v710_v29 = vcombine.high %v702_v2, %v702_v2  ;;  %v1770_v30 = vrot.slane %v1749_v39, %v1503_v14 }
  0x77   :  { %v969_v41 = vcombine.high %v1762_v40, %v1762_v40  ;;  %v717_v50 = vrot.slane %v702_v2, %v1503_v14  ;;  %v727_v31 = vcombine.high %v703_v12, %v703_v12  ;;  %v1777_v10 = vrot.slane %v1762_v40, %v1503_v14 }
  0x78   :  { %1280 = vpow2.f32 %v498_v22  ;;  %v724_v33 = vrot.slane %v710_v29, %v1503_v14  ;;  %v734_v21 = vrot.slane %v703_v12, %v1503_v14  ;;  %v1275_v34 = vpop.eup %1274  ;;  %v1783_v26 = vrot.slane %v1765_v23, %v1503_v14 }
  0x79   :  { %v725_v42 = vcombine.high %v717_v50, %v717_v50  ;;  %v743_v8 = vcombine.high %v704_v17, %v704_v17  ;;  %v750_v32 = vrot.slane %v704_v17, %v1503_v14  ;;  %v1277_v43 = vpop.eup %1276  ;;  %v485_v46 = vmul.f32 0.6931472, %v1275_v34 }
  0x7a   :  { %v726_v9 = vcombine.high %v724_v33, %v724_v33  ;;  %v741_v16 = vrot.slane %v727_v31, %v1503_v14  ;;  %v760_v38 = vcombine.high %v705_v25, %v705_v25  ;;  %v1279_v20 = vpop.eup %1278  ;;  %v487_v49 = vmul.f32 0.6931472, %v1277_v43 }
  0x7b   :  { %v757_v51 = vrot.slane %v743_v8, %v1503_v14  ;;  %v758_v44 = vcombine.high %v750_v32, %v750_v32  ;;  %v767_v52 = vrot.slane %v705_v25, %v1503_v14  ;;  %v489_v53 = vmul.f32 0.6931472, %v1279_v20 }
  0x7c   :  { %v1789_v54 = vadd.f32 %v485_v46, %v459_v56  ;;  %v742_v24 = vcombine.high %v734_v21, %v734_v21  ;;  %v774_v47 = vrot.slane %v760_v38, %v1503_v14  ;;  %v1792_v28 = vadd.f32 %v487_v49, %v460_v37 }
  0x7d   :  { %v759_v58 = vcombine.high %v757_v51, %v757_v51  ;;  %v790_v60 = vsel %vm397_vm5, %v717_v50, 0.0  ;;  %v791_v45 = vsel %vm397_vm5, %v750_v32, 0.0  ;;  %v1796_v0 = vadd.f32 %v489_v53, %v461_v61 }
  0x7e   :  { %v495_v2 = vsub.f32 0.0, %v1789_v54  ;;  %v775_v5 = vcombine.high %v767_v52, %v767_v52  ;;  %v793_v11 = vsel %vm397_vm5, %v725_v42, 0.0  ;;  %v496_v56 = vsub.f32 0.0, %v1792_v28 }
  0x7f   :  { %v794_v12 = vsel %vm397_vm5, %v758_v44, 0.0  ;;  %v796_v13 = vsel %vm397_vm5, %v724_v33, 0.0  ;;  %v797_v37 = vsel %vm397_vm5, %v757_v51, 0.0  ;;  %v497_v15 = vsub.f32 0.0, %v1796_v0 }
  0x80   :  { %v500_v17 = vmul.f32 1.442695, %v495_v2  ;;  %v1805_v22 = vadd.f32 %v791_v45, %v790_v60  ;;  %v1807_v61 = vadd.f32 %v794_v12, %v793_v11  ;;  %v502_v25 = vmul.f32 1.442695, %v496_v56 }
  0x81   :  { %v799_v29 = vsel %vm397_vm5, %v726_v9, 0.0  ;;  %v800_v50 = vsel %vm397_vm5, %v759_v58, 0.0  ;;  %v802_v31 = vsel %vm397_vm5, %v734_v21, 0.0  ;;  %v504_v34 = vmul.f32 1.442695, %v497_v15 }
  0x82   :  { %1282 = vpow2.f32 %v500_v17  ;;  %v1812_v42 = vadd.f32 %v797_v37, %v796_v13  ;;  %v803_v33 = vsel %vm397_vm5, %v767_v52, 0.0  ;;  %v1815_v8 = vadd.f32 %v800_v50, %v799_v29 }
  0x83   :  { %1284 = vpow2.f32 %v502_v25  ;;  %v805_v32 = vsel %vm397_vm5, %v742_v24, 0.0  ;;  %v806_v43 = vsel %vm397_vm5, %v775_v5, 0.0  ;;  %v1819_v46 = vadd.f32 %v803_v33, %v802_v31 }
  0x84   :  { %1286 = vpow2.f32 %v504_v34  ;;  %v808_v9 = vsel %vm397_vm5, %v741_v16, 0.0  ;;  %v809_v21 = vsel %vm397_vm5, %v774_v47, 0.0  ;;  %v1823_v20 = vadd.f32 %v806_v43, %v805_v32 }
  0x85   :  { %v1281_v38 = vpop.eup %1280  ;;  %v823_v49 = vcombine.high %v1735_v59, %v1735_v59  ;;  %v830_v51 = vrot.slane %v1735_v59, %v1503_v14  ;;  %v840_v44 = vcombine.high %v1739_v63, %v1739_v63  ;;  %v847_v53 = vrot.slane %v1739_v63, %v1503_v14 }
  0x86   :  { %v506_v52 = vsub.f32 1.0, %v1281_v38  ;;  %v870_v16 = vrot.slane %v856_v18, %v1503_v14  ;;  %v871_v24 = vcombine.high %v1756_v36, %v1756_v36  ;;  %v1839_v47 = vadd.f32 %v809_v21, %v808_v9 }
  0x87   :  { %v837_v58 = vrot.slane %v823_v49, %v1503_v14  ;;  %v838_v59 = vcombine.high %v830_v51, %v830_v51  ;;  %v873_v60 = vcombine.high %v1749_v39, %v1749_v39  ;;  %v854_v2 = vrot.slane %v840_v44, %v1503_v14 }
  0x88   :  { %v510_v45 = vmul.f32 %v506_v52, %v506_v52  ;;  %v855_v63 = vcombine.high %v847_v53, %v847_v53  ;;  %v872_v5 = vcombine.high %v870_v16, %v870_v16  ;;  %v888_v6 = vcombine.high %v1770_v30, %v1770_v30 }
  0x89   :  { %v839_v11 = vcombine.high %v837_v58, %v837_v58  ;;  %v903_v18 = vsel %vm397_vm5, %v830_v51, 0.0  ;;  %v904_v56 = vsel %vm397_vm5, %v1756_v36, 0.0  ;;  %v887_v13 = vrot.slane %v873_v60, %v1503_v14 }
  0x8a   :  { %v514_v12 = vmul.f32 0.5, %v510_v45  ;;  %v906_v37 = vsel %vm397_vm5, %v838_v59, 0.0  ;;  %v907_v39 = vsel %vm397_vm5, %v871_v24, 0.0  ;;  %v1853_v15 = vadd.f32 %v904_v56, %v903_v18 }
  0x8b   :  { %v909_v17 = vsel %vm397_vm5, %v837_v58, 0.0  ;;  %v910_v25 = vsel %vm397_vm5, %v870_v16, 0.0  ;;  %v912_v29 = vsel %vm397_vm5, %v839_v11, 0.0  ;;  %v1859_v31 = vadd.f32 %v907_v39, %v906_v37 }
  0x8c   :  { %v518_v50 = vmul.f32 %v514_v12, %v1737_v27  ;;  %v913_v36 = vsel %vm397_vm5, %v872_v5, 0.0  ;;  %v915_v34 = vsel %vm397_vm5, %v847_v53, 0.0  ;;  %v1863_v33 = vadd.f32 %v910_v25, %v909_v17 }
  0x8d   :  { %v916_v32 = vsel %vm397_vm5, %v1770_v30, 0.0  ;;  %v918_v43 = vsel %vm397_vm5, %v855_v63, 0.0  ;;  %v919_v9 = vsel %vm397_vm5, %v888_v6, 0.0  ;;  %v1870_v49 = vadd.f32 %v913_v36, %v912_v29 }
  0x8e   :  { %v547_v21 = vrot.slane %v518_v50, %v1503_v14  ;;  %v540_v38 = vcombine.high %v518_v50, %v518_v50  ;;  %v1872_v27 = vadd.f32 %v916_v32, %v915_v34  ;;  %v1874_v44 = vadd.f32 %v919_v9, %v918_v43 }
  0x8f   :  { %v1283_v51 = vpop.eup %1282  ;;  %v921_v52 = vsel %vm397_vm5, %v854_v2, 0.0  ;;  %v922_v53 = vsel %vm397_vm5, %v887_v13, 0.0  ;;  %v936_v30 = vcombine.high %v1745_v35, %v1745_v35  ;;  %v1888_v2 = vrot.slane %v1745_v35, %v1503_v14 }
  0x90   :  { %v1285_v16 = vpop.eup %1284  ;;  %v620_v24 = vsel %vm1560_vm6, %v547_v21, 0.0  ;;  %v507_v58 = vsub.f32 1.0, %v1283_v51  ;;  %v554_v59 = vrot.slane %v540_v38, %v1503_v14  ;;  %v555_v60 = vcombine.high %v547_v21, %v547_v21 }
  0x91   :  { %v1287_v45 = vpop.eup %1286  ;;  %v634_v63 = vsel %vm397_vm5, %v620_v24, 0.0  ;;  %v508_v5 = vsub.f32 1.0, %v1285_v16  ;;  %v1884_v11 = vadd.f32 %v922_v53, %v921_v52  ;;  %v1896_v17 = vrot.slane %v936_v30, %v1503_v14 }
  0x92   :  { %v509_v6 = vsub.f32 1.0, %v1287_v45  ;;  %v511_v18 = vmul.f32 %v507_v58, %v507_v58  ;;  %v556_v56 = vcombine.high %v554_v59, %v554_v59  ;;  %v621_v12 = vsel %vm1571_vm10, %v555_v60, 0.0 }
  0x93   :  { %v512_v13 = vmul.f32 %v508_v5, %v508_v5  ;;  %v622_v37 = vsel %vm1578_vm14, %v554_v59, 0.0  ;;  %v635_v39 = vsel %vm397_vm5, %v621_v12, 0.0  ;;  %v951_v43 = vcombine.high %v1888_v2, %v1888_v2 }
  0x94   :  { %v513_v25 = vmul.f32 %v509_v6, %v509_v6  ;;  %v515_v29 = vmul.f32 0.5, %v511_v18  ;;  %v623_v35 = vsel %vm1586_vm15, %v556_v56, 0.0  ;;  %v636_v50 = vadd.f32 %v635_v39, %v634_v63 }
  0x95   :  { %v516_v36 = vmul.f32 0.5, %v512_v13  ;;  %v637_v34 = vsel %vm397_vm5, %v622_v37, 0.0  ;;  %v639_v32 = vsel %vm397_vm5, %v623_v35, 0.0  ;;  %v953_v51 = vcombine.high %v1759_v19, %v1759_v19 }
  0x96   :  { %v517_v9 = vmul.f32 0.5, %v513_v25  ;;  %v519_v21 = vmul.f32 %v515_v29, %v1789_v54  ;;  %v638_v38 = vadd.f32 %v637_v34, %v636_v50  ;;  %v952_v53 = vcombine.high %v1896_v17, %v1896_v17 }
  0x97   :  { %v520_v52 = vmul.f32 %v516_v36, %v1792_v28  ;;  %v960_v30 = vrot.slane %v1759_v19, %v1503_v14  ;;  %v983_v16 = vrot.slane %v969_v41, %v1503_v14  ;;  %v984_v59 = vcombine.high %v1777_v10, %v1777_v10 }
  0x98   :  { %v521_v24 = vmul.f32 %v517_v9, %v1796_v0  ;;  %v557_v54 = vcombine.high %v519_v21, %v519_v21  ;;  %v564_v58 = vrot.slane %v519_v21, %v1503_v14  ;;  %v640_v45 = vadd.f32 %v639_v32, %v638_v38 }
  0x99   :  { %v573_v28 = vcombine.high %v520_v52, %v520_v52  ;;  %v580_v60 = vrot.slane %v520_v52, %v1503_v14  ;;  %v967_v63 = vrot.slane %v953_v51, %v1503_v14  ;;  %v968_v56 = vcombine.high %v960_v30, %v960_v30 }
  0x9a   :  { %v571_v19 = vrot.slane %v557_v54, %v1503_v14  ;;  %v572_v5 = vcombine.high %v564_v58, %v564_v58  ;;  %v590_v6 = vcombine.high %v521_v24, %v521_v24  ;;  %v597_v40 = vrot.slane %v521_v24, %v1503_v14 }
  0x9b   :  { %v587_v41 = vrot.slane %v573_v28, %v1503_v14  ;;  %v588_v0 = vcombine.high %v580_v60, %v580_v60  ;;  %v624_v18 = vsel %vm2090_vm8, %v564_v58, 0.0  ;;  %v627_v29 = vsel %vm1560_vm6, %v580_v60, 0.0 }
  0x9c   :  { %v604_v12 = vrot.slane %v590_v6, %v1503_v14  ;;  %v605_v13 = vcombine.high %v597_v40, %v597_v40  ;;  %v625_v37 = vsel %vm2091_vm0, %v572_v5, 0.0  ;;  %v626_v39 = vsel %vm2092_vm4, %v571_v19, 0.0 }
  0x9d   :  { %v589_v25 = vcombine.high %v587_v41, %v587_v41  ;;  %v628_v35 = vsel %vm1571_vm10, %v588_v0, 0.0  ;;  %v629_v50 = vsel %vm1578_vm14, %v587_v41, 0.0  ;;  %v631_v36 = vsel %vm2090_vm8, %v597_v40, 0.0 }
  0x9e   :  { %v632_v34 = vsel %vm2091_vm0, %v605_v13, 0.0  ;;  %v641_v32 = vsel %vm397_vm5, %v624_v18, 0.0  ;;  %v643_v9 = vsel %vm397_vm5, %v625_v37, 0.0  ;;  %v633_v38 = vsel %vm2092_vm4, %v604_v12, 0.0 }
  0x9f   :  { %v630_v21 = vsel %vm1586_vm15, %v589_v25, 0.0  ;;  %v642_v51 = vadd.f32 %v641_v32, %v640_v45  ;;  %v645_v52 = vsel %vm397_vm5, %v626_v39, 0.0  ;;  %v647_v24 = vsel %vm397_vm5, %v627_v29, 0.0 }
  0xa0   :  { %v649_v54 = vsel %vm397_vm5, %v628_v35, 0.0  ;;  %v651_v58 = vsel %vm397_vm5, %v629_v50, 0.0  ;;  %v653_v28 = vsel %vm397_vm5, %v630_v21, 0.0  ;;  %v655_v19 = vsel %vm397_vm5, %v631_v36, 0.0 }
  0xa1   :  { %v644_v60 = vadd.f32 %v643_v9, %v642_v51  ;;  %v657_v5 = vsel %vm397_vm5, %v632_v34, 0.0  ;;  %v985_v6 = vcombine.high %v983_v16, %v983_v16  ;;  %v659_v40 = vsel %vm397_vm5, %v633_v38, 0.0 }
  0xa2   :  { %v986_v45 = vcombine.high %v1765_v23, %v1765_v23  ;;  %v1016_v41 = vsel %vm397_vm5, %v1888_v2, 0.0  ;;  %v1017_v0 = vsel %vm397_vm5, %v1777_v10, 0.0  ;;  %v1001_v12 = vcombine.high %v1783_v26, %v1783_v26 }
  0xa3   :  { %v646_v18 = vadd.f32 %v645_v52, %v644_v60  ;;  %v1019_v13 = vsel %vm397_vm5, %v951_v43, 0.0  ;;  %v1020_v37 = vsel %vm397_vm5, %v984_v59, 0.0  ;;  %v1018_v25 = vadd.f32 %v1017_v0, %v1016_v41 }
  0xa4   :  { %v1000_v39 = vrot.slane %v986_v45, %v1503_v14  ;;  %v1022_v23 = vsel %vm397_vm5, %v1896_v17, 0.0  ;;  %v1023_v29 = vsel %vm397_vm5, %v983_v16, 0.0  ;;  %v1021_v35 = vadd.f32 %v1020_v37, %v1019_v13 }
  0xa5   :  { %v648_v2 = vadd.f32 %v647_v24, %v646_v18  ;;  %v1025_v10 = vsel %vm397_vm5, %v952_v53, 0.0  ;;  %v1026_v50 = vsel %vm397_vm5, %v985_v6, 0.0  ;;  %v1024_v36 = vadd.f32 %v1023_v29, %v1022_v23 }
  0xa6   :  { %v1028_v34 = vsel %vm397_vm5, %v960_v30, 0.0  ;;  %v1029_v43 = vsel %vm397_vm5, %v1783_v26, 0.0  ;;  %v1031_v14 = vsel %vm397_vm5, %v968_v56, 0.0  ;;  %v1027_v32 = vadd.f32 %v1026_v50, %v1025_v10 }
  0xa7   :  { %v650_v59 = vadd.f32 %v649_v54, %v648_v2  ;;  %v1030_v9 = vadd.f32 %v1029_v43, %v1028_v34  ;;  %v1032_v17 = vsel %vm397_vm5, %v1001_v12, 0.0  ;;  %v1034_v21 = vsel %vm397_vm5, %v967_v63, 0.0 }
  0xa8   :  { %v1033_v16 = vadd.f32 %v1032_v17, %v1031_v14  ;;  %v1037_v53 = vadd.f32 %v1853_v15, %v1805_v22  ;;  %v1038_v38 = vadd.f32 %v1859_v31, %v1807_v61  ;;  %v1035_v51 = vsel %vm397_vm5, %v1000_v39, 0.0 }
  0xa9   :  { %v652_v30 = vadd.f32 %v651_v58, %v650_v59  ;;  %v1039_v26 = vadd.f32 %v1863_v33, %v1812_v42  ;;  %v1040_v56 = vadd.f32 %v1870_v49, %v1815_v8  ;;  %v1041_v52 = vadd.f32 %v1872_v27, %v1819_v46 }
  0xaa   :  { %v1042_v63 = vadd.f32 %v1874_v44, %v1823_v20  ;;  %v1043_v15 = vadd.f32 %v1884_v11, %v1839_v47  ;;  %v1044_v24 = vadd.f32 1e-06, %v1037_v53  ;;  %v1045_v54 = vadd.f32 1e-06, %v1038_v38 }
  0xab   :  { %v654_v31 = vadd.f32 %v653_v28, %v652_v30  ;;  %v1046_v58 = vadd.f32 1e-06, %v1039_v26  ;;  %v1047_v60 = vadd.f32 1e-06, %v1040_v56  ;;  %v1036_v6 = vadd.f32 %v1035_v51, %v1034_v21 }
  0xac   :  { %v1048_v45 = vadd.f32 1e-06, %v1041_v52  ;;  %v1049_v33 = vadd.f32 1e-06, %v1042_v63  ;;  %1288 = vrcp.f32 %v1044_v24  ;;  %v1065_v49 = vadd.f32 %v1018_v25, %v1805_v22 }
  0xad   :  { %v656_v41 = vadd.f32 %v655_v19, %v654_v31  ;;  %1290 = vrcp.f32 %v1045_v54  ;;  %v1066_v27 = vadd.f32 %v1021_v35, %v1807_v61  ;;  %v1050_v0 = vadd.f32 1e-06, %v1043_v15 }
  0xae   :  { %1292 = vrcp.f32 %v1046_v58  ;;  %v1067_v44 = vadd.f32 %v1024_v36, %v1812_v42  ;;  %v1068_v11 = vadd.f32 %v1027_v32, %v1815_v8  ;;  %v1069_v18 = vadd.f32 %v1030_v9, %v1819_v46 }
  0xaf   :  { %v658_v28 = vadd.f32 %v657_v5, %v656_v41  ;;  %1294 = vrcp.f32 %v1047_v60  ;;  %v1070_v12 = vadd.f32 %v1033_v16, %v1823_v20  ;;  %v1072_v13 = vadd.f32 1e-06, %v1065_v49 }
  0xb0   :  { %1296 = vrcp.f32 %v1048_v45  ;;  %v1073_v19 = vadd.f32 1e-06, %v1066_v27  ;;  %v1071_v39 = vadd.f32 %v1036_v6, %v1839_v47  ;;  %v1074_v25 = vadd.f32 1e-06, %v1067_v44 }
  0xb1   :  { %v660_v37 = vadd.f32 %v659_v40, %v658_v28  ;;  %1298 = vrcp.f32 %v1049_v33  ;;  %v1075_v23 = vadd.f32 1e-06, %v1068_v11  ;;  %v1076_v29 = vadd.f32 1e-06, %v1069_v18 }
  0xb2   :  { %1300 = vrcp.f32 %v1050_v0  ;;  %v1077_v2 = vadd.f32 1e-06, %v1070_v12  ;;  %v1078_v5 = vadd.f32 1e-06, %v1071_v39 }
  0xb3   :  { %661 = vadd.xlane.f32.xlu0 %v660_v37  ;;  %1302 = vrcp.f32 %v1072_v13 }
  0xb4   :  { %1304 = vrcp.f32 %v1073_v19 }
  0xb5   :  { %1306 = vrcp.f32 %v1074_v25 }
  0xb6   :  { %1308 = vrcp.f32 %v1075_v23 }
  0xb7   :  { %1310 = vrcp.f32 %v1076_v29 }
  0xb8   :  { %1312 = vrcp.f32 %v1077_v2 }
  0xb9   :  { %v1289_v35 = vpop.eup %1288  ;;  %1314 = vrcp.f32 %v1078_v5 }
  0xba   :  { %v1291_v10 = vpop.eup %1290  ;;  %v1052_v50 = vmul.f32 %v1289_v35, %v1805_v22 }
  0xbb   :  { %v1293_v40 = vpop.eup %1292  ;;  %v1054_v34 = vmul.f32 %v1291_v10, %v1807_v61 }
  0xbc   :  { %v1295_v36 = vpop.eup %1294  ;;  %v1056_v14 = vmul.f32 %v1293_v40, %v1812_v42  ;;  %v1107_v16 = vmul.f32 16.0, %v1052_v50  ;;  %v1093_v25 = vmul.f32 17.0, %v1052_v50 }
  0xbd   :  { %v1297_v43 = vpop.eup %1296  ;;  %v1058_v32 = vmul.f32 %v1295_v36, %v1815_v8  ;;  %v1108_v38 = vmul.f32 16.0, %v1054_v34 }
  0xbe   :  { %v1299_v59 = vpop.eup %1298  ;;  %v1060_v17 = vmul.f32 %v1297_v43, %v1819_v46  ;;  %v1109_v56 = vmul.f32 16.0, %v1056_v14  ;;  %v1095_v23 = vmul.f32 17.0, %v1056_v14 }
  0xbf   :  { %v1301_v9 = vpop.eup %1300  ;;  %v1062_v53 = vmul.f32 %v1299_v59, %v1823_v20  ;;  %v1110_v15 = vmul.f32 16.0, %v1058_v32  ;;  %v1096_v29 = vmul.f32 17.0, %v1058_v32 }
  0xc0   :  { %v1303_v21 = vpop.eup %1302  ;;  %v1064_v51 = vmul.f32 %v1301_v9, %v1839_v47  ;;  %v1111_v54 = vmul.f32 16.0, %v1060_v17 }
  0xc1   :  { %v1305_v30 = vpop.eup %1304  ;;  %v1080_v26 = vmul.f32 %v1303_v21, %v1805_v22  ;;  %v1112_v45 = vmul.f32 16.0, %v1062_v53  ;;  %v1098_v5 = vmul.f32 17.0, %v1062_v53 }
  0xc2   :  { %v1307_v52 = vpop.eup %1306  ;;  %v1082_v63 = vmul.f32 %v1305_v30, %v1807_v61  ;;  %v1113_v27 = vmul.f32 16.0, %v1064_v51  ;;  %v1099_v10 = vmul.f32 17.0, %v1064_v51 }
  0xc3   :  { %v1309_v24 = vpop.eup %1308  ;;  %v1084_v31 = vmul.f32 %v1307_v52, %v1812_v42  ;;  %v1114_v58 = vadd.f32 %v1107_v16, %v1080_v26  ;;  %v1100_v2 = vmul.f32 %v1093_v25, %v1080_v26 }
  0xc4   :  { %v1311_v60 = vpop.eup %1310  ;;  %v1086_v6 = vmul.f32 %v1309_v24, %v1815_v8  ;;  %v1115_v33 = vadd.f32 %v1108_v38, %v1082_v63 }
  0xc5   :  { %v1313_v41 = vpop.eup %1312  ;;  %v1088_v49 = vmul.f32 %v1311_v60, %v1819_v46  ;;  %v1116_v22 = vadd.f32 %v1109_v56, %v1084_v31  ;;  %v1121_v0 = vadd.f32 1e-06, %v1114_v58  ;;  %v1102_v40 = vmul.f32 %v1095_v23, %v1084_v31 }
  0xc6   :  { %v1315_v44 = vpop.eup %1314  ;;  %v1090_v61 = vmul.f32 %v1313_v41, %v1823_v20  ;;  %v1117_v11 = vadd.f32 %v1110_v15, %v1086_v6  ;;  %v1122_v28 = vadd.f32 1e-06, %v1115_v33  ;;  %v1094_v20 = vmul.f32 17.0, %v1054_v34 }
  0xc7   :  { %v1092_v42 = vmul.f32 %v1315_v44, %v1839_v47  ;;  %v1118_v18 = vadd.f32 %v1111_v54, %v1088_v49  ;;  %v1123_v12 = vadd.f32 1e-06, %v1116_v22  ;;  %1316 = vrcp.f32 %v1121_v0 }
  0xc8   :  { %v1119_v13 = vadd.f32 %v1112_v45, %v1090_v61  ;;  %v1124_v19 = vadd.f32 1e-06, %v1117_v11  ;;  %1318 = vrcp.f32 %v1122_v28  ;;  %v1097_v47 = vmul.f32 17.0, %v1060_v17 }
  0xc9   :  { %v1120_v8 = vadd.f32 %v1113_v27, %v1092_v42  ;;  %v1125_v37 = vadd.f32 1e-06, %v1118_v18  ;;  %1320 = vrcp.f32 %v1123_v12  ;;  %v1101_v35 = vmul.f32 %v1094_v20, %v1082_v63 }
  0xca   :  { %v1126_v39 = vadd.f32 1e-06, %v1119_v13  ;;  %1322 = vrcp.f32 %v1124_v19  ;;  %v1103_v43 = vmul.f32 %v1096_v29, %v1086_v6  ;;  %v1104_v9 = vmul.f32 %v1097_v47, %v1088_v49 }
  0xcb   :  { %v1127_v46 = vadd.f32 1e-06, %v1120_v8  ;;  %1324 = vrcp.f32 %v1125_v37  ;;  %v1105_v38 = vmul.f32 %v1098_v5, %v1090_v61  ;;  %v1106_v50 = vmul.f32 %v1099_v10, %v1092_v42 }
  0xcc   :  { %1326 = vrcp.f32 %v1126_v39  ;;  %v1402_v5 = vmov 0.0  }
  0xcd   :  { %1328 = vrcp.f32 %v1127_v46 }
  0xd4   :  { %v1317_v36 = vpop.eup %1316 }
  0xd5   :  { %v1319_v59 = vpop.eup %1318  ;;  %v1129_v16 = vmul.f32 %v1317_v36, %v1100_v2 }
  0xd6   :  { %v1321_v21 = vpop.eup %1320  ;;  %v1131_v30 = vmul.f32 %v1319_v59, %v1101_v35 }
  0xd7   :  { %v1323_v56 = vpop.eup %1322  ;;  %v1133_v52 = vmul.f32 %v1321_v21, %v1102_v40  ;;  %v1142_v34 = vsel %vm1560_vm6, %v1129_v16, 0.0  ;;  %vm1176_vm6 = vcmp.eq.s32.totalorder %v1425_v1, 1 }
  0xd8   :  { %v1325_v14 = vpop.eup %1324  ;;  %v1135_v32 = vmul.f32 %v1323_v56, %v1103_v43  ;;  %v1143_v17 = vsel %vm1571_vm10, %v1131_v30, 0.0  ;;  %v1149_v53 = vsel %vm397_vm5, %v1142_v34, 0.0  ;;  %vm1171_vm10 = vcmp.eq.s32.totalorder %v1425_v1, 0 }
  0xd9   :  { %v1327_v51 = vpop.eup %1326  ;;  %v1137_v26 = vmul.f32 %v1325_v14, %v1104_v9  ;;  %v1144_v63 = vsel %vm1578_vm14, %v1133_v52, 0.0  ;;  %v1150_v15 = vsel %vm397_vm5, %v1143_v17, 0.0  ;;  %v1218_v35 = vsel %vm1176_vm6, 1.0, %v1402_v5 }
  0xda   :  { %v1329_v24 = vpop.eup %1328  ;;  %v1139_v31 = vmul.f32 %v1327_v51, %v1105_v38  ;;  %v1145_v48 = vsel %vm1586_vm15, %v1135_v32, 0.0  ;;  %v1151_v54 = vadd.f32 %v1150_v15, %v1149_v53  ;;  %v1152_v58 = vsel %vm397_vm5, %v1144_v63, 0.0 }
  0xdb   :  { %v1141_v60 = vmul.f32 %v1329_v24, %v1106_v50  ;;  %v1146_v55 = vsel %vm2090_vm8, %v1137_v26, 0.0  ;;  %v1154_v6 = vsel %vm397_vm5, %v1145_v48, 0.0  ;;  %v1217_v40 = vsel %vm1171_vm10, 1.0, %v1402_v5 }
  0xdc   :  { %v1147_v57 = vsel %vm2091_vm0, %v1139_v31, 0.0  ;;  %v1153_v45 = vadd.f32 %v1152_v58, %v1151_v54  ;;  %v1156_v33 = vsel %vm397_vm5, %v1146_v55, 0.0  ;;  %vm1182_vm14 = vcmp.eq.s32.totalorder %v1425_v1, 2 }
  0xdd   :  { %v1148_v41 = vsel %vm2092_vm4, %v1141_v60, 0.0  ;;  %v1158_v49 = vsel %vm397_vm5, %v1147_v57, 0.0  ;;  %v1219_v9 = vsel %vm1182_vm14, 1.0, %v1402_v5 }
  0xde   :  { %v1155_v62 = vadd.f32 %v1154_v6, %v1153_v45  ;;  %v1160_v22 = vsel %vm397_vm5, %v1148_v41, 0.0 }
  0xe0   :  { %v1157_v27 = vadd.f32 %v1156_v33, %v1155_v62 }
  0xe2   :  { %v1159_v0 = vadd.f32 %v1158_v49, %v1157_v27 }
  0xe4   :  { %v1161_v3 = vadd.f32 %v1160_v22, %v1159_v0 }
  0xe6   :  { %1162 = vadd.xlane.f32.xlu1 %v1161_v3 }
  0xec   :  { %v426_v44 = vpop.xlane.xlu0 %425 }
  0xed   :  { %v427_v61 = vrot.slane %v426_v44, 4 }
  0xef   :  { %v428_v11 = vadd.f32 %v427_v61, %v426_v44 }
  0xf1   :  { %v429_v4 = vrot.slane %v428_v11, 2 }
  0xf3   :  { %v430_v28 = vadd.f32 %v429_v4, %v428_v11 }
  0xf5   :  { %v431_v42 = vrot.slane %v430_v28, 1 }
  0xf7   :  { %v432_v18 = vadd.f32 %v431_v42, %v430_v28 }
  0xf9   :  { %1234 = vpush %v432_v18 }
 0x12a   :  { %s1235_s0 = spop %1234 }
 0x12b   :  { %v1174_v36 = vstv %s1235_s0 }
 0x12c   :  { %v1175_v59 = vmul.f32 %v1217_v40, %v1174_v36 }
 0x13c   :  { %v662_v12 = vpop.xlane.xlu0 %661 }
 0x13d   :  { %v663_v7 = vrot.slane %v662_v12, 4 }
 0x13f   :  { %v664_v13 = vadd.f32 %v663_v7, %v662_v12 }
 0x141   :  { %v665_v19 = vrot.slane %v664_v13, 2 }
 0x143   :  { %v666_v8 = vadd.f32 %v665_v19, %v664_v13 }
 0x145   :  { %v667_v37 = vrot.slane %v666_v8, 1 }
 0x147   :  { %v668_v39 = vadd.f32 %v667_v37, %v666_v8 }
 0x149   :  { %1236 = vpush %v668_v39 }
 0x16f   :  { %v1163_v46 = vpop.xlane.xlu1 %1162 }
 0x170   :  { %v1164_v25 = vrot.slane %v1163_v46, 4 }
 0x172   :  { %v1165_v20 = vadd.f32 %v1164_v25, %v1163_v46 }
 0x174   :  { %v1166_v23 = vrot.slane %v1165_v20, 2 }
 0x176   :  { %v1167_v29 = vadd.f32 %v1166_v23, %v1165_v20 }
 0x178   :  { %v1168_v47 = vrot.slane %v1167_v29, 1 }
 0x17a   :  { %v1169_v2 = vadd.f32 %v1168_v47, %v1167_v29  ;;  %s1237_s1 = spop %1236 }
 0x17b   :  { %v1179_v10 = vstv %s1237_s1 }
 0x17c   :  { %1238 = vpush %v1169_v2  ;;  %v1180_v43 = vmul.f32 %v1218_v35, %v1179_v10 }
 0x17e   :  { %v1181_v16 = vadd.f32 %v1180_v43, %v1175_v59 }
 0x1ad   :  { %s1239_s21 = spop %1238 }
 0x1ae   :  { %v1185_v21 = vstv %s1239_s21 }
 0x1af   :  { %v1186_v38 = vmul.f32 %v1219_v9, %v1185_v21 }
 0x1b1   :  { %v1187_v30 = vadd.f32 %v1186_v38, %v1181_v16 }
 0x1b3   :  { %1188 = vst [vmem:[#allocation7] sm:$0x1] %v1187_v30 }
 0x1b4   :  { %1381 = shalt.err (!%p1378_p0)
}
 0x1b5   :  { %1198 = dma.vmem_to_hbm [thread:$0]  %s1196_s23, 16, %s2043_s2, [#allocation4]  }
 0x1b6   :  { %1394 = dma.done.wait [#allocation4], 16  }
 0x1b7   :  { %1395 = vsyncadd [#allocation4], 4294967280 }
 0x1b8   :  { %1202 = vsyncpa [#allocation3], 1 }
 0x1b9   :  { %1203 = vsyncpa [#allocation6], 1 }
 0x1ba   :  { %1204 = vsyncpa [#allocation4], 1 }

</bundles_post_ra>
